<compile_context>
chip_gen: v7x
topology: tpu7x:2x2x1
jax: 0.10.0
libtpu: 0.0.40
codegen_flags: <defaults>
</compile_context>

<pallas_src>
import jax
import jax.numpy as jnp
from jax.experimental import pallas as pl
from jax.experimental.pallas import tpu as pltpu


def _round_up(n, m):
    return ((n + m - 1) // m) * m


def _cdiv(a, b):
    return (a + b - 1) // b


def _vmem_capacity_bytes():
    try:
        return int(pltpu.get_tpu_info().vmem_capacity_bytes)
    except Exception:
        return 64 << 20  # conservative fallback: v7x per-TensorCore VMEM


def llata_encoder_kernel(x_ref, w1_ref, b1_ref, w2_ref, b2_ref, o_ref):
    # Cast the streamed activations in-kernel (no padded HBM copy of x).
    x = x_ref[...].astype(w1_ref.dtype)
    # fc1 + ReLU: MXU matmul, f32 accumulate, f32 bias/ReLU.
    h = jnp.dot(x, w1_ref[...], preferred_element_type=jnp.float32)
    h = jnp.maximum(h + b1_ref[...], 0.0)
    # fc2 + ReLU.
    out = jnp.dot(h.astype(w2_ref.dtype), w2_ref[...],
                  preferred_element_type=jnp.float32)
    out = jnp.maximum(out + b2_ref[...], 0.0)
    o_ref[...] = out.astype(o_ref.dtype)


def prepare_llata_params(w1, b1, w2, b2, *, mm_dtype=jnp.bfloat16, lane=128):
    """Pad/cast the (small, VMEM-resident) weights ONCE, outside the forward.

    w1: (obs_dim, hidden)   b1: (hidden,) or (1, hidden)
    w2: (hidden, feature)   b2: (feature,) or (1, feature)
    (weights stored (in, out), i.e. transposed vs. torch nn.Linear.weight)

    Only the hidden dim is zero-padded to a lane multiple -- mathematically
    exact: padded hidden units are relu(0 + 0) = 0 and multiply zero rows of
    w2.  obs_dim / feature are left as-is so x and the output need no padded
    HBM copies.
    """
    obs_dim, hidden = w1.shape
    feature = w2.shape[1]
    H = _round_up(hidden, lane)
    w1p = jnp.zeros((obs_dim, H), mm_dtype).at[:, :hidden].set(w1.astype(mm_dtype))
    b1p = jnp.zeros((1, H), jnp.float32).at[:, :hidden].set(
        jnp.reshape(b1, (1, hidden)).astype(jnp.float32))
    w2p = jnp.zeros((H, feature), mm_dtype).at[:hidden, :].set(w2.astype(mm_dtype))
    b2p = jnp.reshape(b2, (1, feature)).astype(jnp.float32)
    return w1p, b1p, w2p, b2p


def llata_encoder(x, params, *, batch_tile=512):
    """Fused 2-layer MLP forward.  x: (B, obs_dim) f32 -> (B, feature) f32."""
    w1p, b1p, w2p, b2p = params
    B, obs_dim = x.shape
    K = obs_dim
    assert w1p.shape[0] == K, "prepared w1 does not match x's obs_dim"
    H = w1p.shape[1]
    F = w2p.shape[1]
    mm_bytes = jnp.dtype(w1p.dtype).itemsize
    x_bytes = jnp.dtype(x.dtype).itemsize

    # ---- VMEM budget (generation aware) --------------------------------
    cap = _vmem_capacity_bytes()
    # <= ~48 MiB of v7x's 64 MiB; up to ~112 MiB of v5e/v6e's 128 MiB.
    budget = max(16 << 20, min(cap - (16 << 20), 112 << 20))

    # Pallas double-buffers every input (even with a constant index_map), so
    # count the resident weights/biases twice.
    fixed = 2 * ((K * H + H * F) * mm_bytes + (H + F) * 4)
    per_row = (2 * K * x_bytes      # x tile, double-buffered
               + 2 * F * 4          # out tile, double-buffered (f32)
               + (H + F) * 4)       # f32 intermediates
    headroom = 8 << 20
    max_bt = max(8, (budget - fixed - headroom) // per_row)

    # ---- batch tile -----------------------------------------------------
    bt = int(min(batch_tile, max_bt, _round_up(B, 8)))
    bt = max(8, (bt // 8) * 8)
    # Give the 'parallel' grid axis >= 2 steps so both v7x TCs get work.
    if B > 8 and _cdiv(B, bt) < 2:
        bt = max(8, _round_up(_cdiv(B, 2), 8))
    grid = (_cdiv(B, bt),)

    vmem_limit = int(min(budget, max(16 << 20, fixed + bt * per_row + headroom)))

    cost = pl.CostEstimate(
        flops=2 * B * (K * H + H * F),
        transcendentals=0,
        bytes_accessed=(B * K * x_bytes + (K * H + H * F) * mm_bytes
                        + (H + F) * 4 + B * F * 4),
    )

    return pl.pallas_call(
        llata_encoder_kernel,
        out_shape=jax.ShapeDtypeStruct((B, F), x.dtype),
        grid=grid,
        in_specs=[
            # Streamed batch slab; full-extent K (== obs_dim) -> no lane pad.
            pl.BlockSpec((bt, K), lambda i: (i, 0)),
            # Weights / biases: constant index_map -> VMEM-resident.
            pl.BlockSpec((K, H), lambda i: (0, 0)),
            pl.BlockSpec((1, H), lambda i: (0, 0)),
            pl.BlockSpec((H, F), lambda i: (0, 0)),
            pl.BlockSpec((1, F), lambda i: (0, 0)),
        ],
        # Full-extent feature dim -> no padded-F output or wrapper slice.
        out_specs=pl.BlockSpec((bt, F), lambda i: (i, 0)),
        compiler_params=pltpu.CompilerParams(
            dimension_semantics=("parallel",),
            vmem_limit_bytes=vmem_limit,
        ),
        cost_estimate=cost,
    )(x, w1p, b1p, w2p, b2p)


def make_params(key, obs_dim, hidden_size, feature_size):
    """Deterministic synthetic parameters (Kaiming-uniform-ish like PyTorch)."""
    k1, k2, k3, k4 = jax.random.split(key, 4)
    lim1 = 1.0 / jnp.sqrt(obs_dim)
    lim2 = 1.0 / jnp.sqrt(hidden_size)
    # Stored as (in, out), i.e. transposed vs. nn.Linear.weight.
    w1 = jax.random.uniform(k1, (obs_dim, hidden_size), jnp.float32, -lim1, lim1)
    b1 = jax.random.uniform(k2, (hidden_size,), jnp.float32, -lim1, lim1)
    w2 = jax.random.uniform(k3, (hidden_size, feature_size), jnp.float32, -lim2, lim2)
    b2 = jax.random.uniform(k4, (feature_size,), jnp.float32, -lim2, lim2)
    return w1, b1, w2, b2


if __name__ == "__main__":
    # Small shapes consistent with the module: x is (batch, observation_size + tau_idx).
    batch = 8
    obs_dim = 32
    hidden_size = 64
    feature_size = 32

    key = jax.random.PRNGKey(0)
    kx, kp = jax.random.split(key)
    x = jax.random.normal(kx, (batch, obs_dim), jnp.float32)
    w1, b1, w2, b2 = make_params(kp, obs_dim, hidden_size, feature_size)

    params = prepare_llata_params(w1, b1, w2, b2)   # one-time pad/cast
    out = llata_encoder(x, params)
    out = jax.block_until_ready(out)

    # Pure-JAX reference using the same bf16-input / f32-accumulate math as
    # the kernel (structurally identical to the PyTorch forward).
    xq, w1q, w2q = (a.astype(jnp.bfloat16) for a in (x, w1, w2))
    ref_h = jnp.maximum(
        jnp.dot(xq, w1q, preferred_element_type=jnp.float32) + b1[None, :], 0.0)
    ref = jnp.maximum(
        jnp.dot(ref_h.astype(jnp.bfloat16), w2q,
                preferred_element_type=jnp.float32) + b2[None, :], 0.0)

    assert out.shape == (batch, feature_size)
    assert jnp.allclose(out, ref, atol=2e-3, rtol=2e-3), (
        float(jnp.max(jnp.abs(out - ref))))

    print("KERNEL_OK")
</pallas_src>

<mosaic_0001>
module attributes {stable_mosaic.version = 11 : i64} {
  func.func @llata_encoder_kernel(%arg0: i32, %arg1: memref<8x32xf32, #tpu.memory_space<vmem>>, %arg2: memref<32x128xbf16, #tpu.memory_space<vmem>>, %arg3: memref<1x128xf32, #tpu.memory_space<vmem>>, %arg4: memref<128x32xbf16, #tpu.memory_space<vmem>>, %arg5: memref<1x32xf32, #tpu.memory_space<vmem>>, %arg6: memref<8x32xf32, #tpu.memory_space<vmem>>) attributes {dimension_semantics = [#tpu.dimension_semantics<parallel>], iteration_bounds = array<i64: 1>, scalar_prefetch = 0 : i64, scratch_operands = 0 : i64, tpu.core_type = #tpu.core_type<tc>, window_params = [{transform_indices = @transform_0, window_bounds = array<i64: 8, 32>}, {pipeline_mode = #tpu.pipeline_mode<synchronous>, transform_indices = @transform_1, window_bounds = array<i64: 32, 128>}, {pipeline_mode = #tpu.pipeline_mode<synchronous>, transform_indices = @transform_2, window_bounds = array<i64: 1, 128>}, {pipeline_mode = #tpu.pipeline_mode<synchronous>, transform_indices = @transform_3, window_bounds = array<i64: 128, 32>}, {pipeline_mode = #tpu.pipeline_mode<synchronous>, transform_indices = @transform_4, window_bounds = array<i64: 1, 32>}, {transform_indices = @transform_5, window_bounds = array<i64: 8, 32>}]} {
    %c0 = arith.constant 0 : index
    %c0_0 = arith.constant 0 : index
    %0 = vector.load %arg1[%c0, %c0_0] : memref<8x32xf32, #tpu.memory_space<vmem>>, vector<8x32xf32>
    %1 = arith.truncf %0 : vector<8x32xf32> to vector<8x32xbf16>
    %c0_1 = arith.constant 0 : index
    %c0_2 = arith.constant 0 : index
    %2 = vector.load %arg2[%c0_1, %c0_2] : memref<32x128xbf16, #tpu.memory_space<vmem>>, vector<32x128xbf16>
    %cst = arith.constant dense<0.000000e+00> : vector<8x128xf32>
    %3 = tpu.matmul %1, %2, %cst {dimension_numbers = #tpu.dot_dimension_numbers<[1], [0], [0], [1], [0, 0, 1, 1], [], []>} : vector<8x32xbf16>, vector<32x128xbf16>, vector<8x128xf32> -> vector<8x128xf32>
    %c0_3 = arith.constant 0 : index
    %c0_4 = arith.constant 0 : index
    %4 = vector.load %arg3[%c0_3, %c0_4] : memref<1x128xf32, #tpu.memory_space<vmem>>, vector<1x128xf32>
    %5 = vector.broadcast %4 : vector<1x128xf32> to vector<8x128xf32>
    %6 = arith.addf %3, %5 : vector<8x128xf32>
    %cst_5 = arith.constant 0.000000e+00 : f32
    %7 = vector.broadcast %cst_5 : f32 to vector<8x128xf32>
    %8 = arith.maximumf %6, %7 : vector<8x128xf32>
    %9 = arith.truncf %8 : vector<8x128xf32> to vector<8x128xbf16>
    %c0_6 = arith.constant 0 : index
    %c0_7 = arith.constant 0 : index
    %10 = vector.load %arg4[%c0_6, %c0_7] : memref<128x32xbf16, #tpu.memory_space<vmem>>, vector<128x32xbf16>
    %cst_8 = arith.constant dense<0.000000e+00> : vector<8x32xf32>
    %11 = tpu.matmul %9, %10, %cst_8 {dimension_numbers = #tpu.dot_dimension_numbers<[1], [0], [0], [1], [0, 0, 1, 1], [], []>} : vector<8x128xbf16>, vector<128x32xbf16>, vector<8x32xf32> -> vector<8x32xf32>
    %c0_9 = arith.constant 0 : index
    %c0_10 = arith.constant 0 : index
    %12 = vector.load %arg5[%c0_9, %c0_10] : memref<1x32xf32, #tpu.memory_space<vmem>>, vector<1x32xf32>
    %13 = vector.broadcast %12 : vector<1x32xf32> to vector<8x32xf32>
    %14 = arith.addf %11, %13 : vector<8x32xf32>
    %cst_11 = arith.constant 0.000000e+00 : f32
    %15 = vector.broadcast %cst_11 : f32 to vector<8x32xf32>
    %16 = arith.maximumf %14, %15 : vector<8x32xf32>
    %c0_12 = arith.constant 0 : index
    %c0_13 = arith.constant 0 : index
    %17 = vector.load %arg6[%c0_12, %c0_13] : memref<8x32xf32, #tpu.memory_space<vmem>>, vector<8x32xf32>
    tpu.vector_store %arg6[%c0_12, %c0_13], %16 {strides = array<i32>} : memref<8x32xf32, #tpu.memory_space<vmem>>, vector<8x32xf32>,
    return
  }
  func.func @transform_0(%arg0: i32) -> (i32, i32) {
    %c0_i32 = arith.constant 0 : i32
    %c0_i32_0 = arith.constant 0 : i32
    return %arg0, %c0_i32 : i32, i32
  }
  func.func @transform_1(%arg0: i32) -> (i32, i32) {
    %c0_i32 = arith.constant 0 : i32
    %c0_i32_0 = arith.constant 0 : i32
    %c0_i32_1 = arith.constant 0 : i32
    return %c0_i32, %c0_i32_0 : i32, i32
  }
  func.func @transform_2(%arg0: i32) -> (i32, i32) {
    %c0_i32 = arith.constant 0 : i32
    %c0_i32_0 = arith.constant 0 : i32
    %c0_i32_1 = arith.constant 0 : i32
    return %c0_i32, %c0_i32_0 : i32, i32
  }
  func.func @transform_3(%arg0: i32) -> (i32, i32) {
    %c0_i32 = arith.constant 0 : i32
    %c0_i32_0 = arith.constant 0 : i32
    %c0_i32_1 = arith.constant 0 : i32
    return %c0_i32, %c0_i32_0 : i32, i32
  }
  func.func @transform_4(%arg0: i32) -> (i32, i32) {
    %c0_i32 = arith.constant 0 : i32
    %c0_i32_0 = arith.constant 0 : i32
    %c0_i32_1 = arith.constant 0 : i32
    return %c0_i32, %c0_i32_0 : i32, i32
  }
  func.func @transform_5(%arg0: i32) -> (i32, i32) {
    %c0_i32 = arith.constant 0 : i32
    %c0_i32_0 = arith.constant 0 : i32
    return %arg0, %c0_i32 : i32, i32
  }
}

</mosaic_0001>

<bundles_post_ra>
// kernel: tpu_custom_call.1
= control target key start
LH: loop header
LB: loop body
LE: loop exit
PB: predicated region body
PF: predicated region fallthrough
CT: control target
= control target key end

     0   :  { %v310_v1 = vmov 0.0   ;;  %vm311_vm0 = vmmov 0   ;;  %vm47_vm1 = vcmask 261120   ;;  %s396_s0 = inlined_call_operand.vmem [shape: f32[8,32], index: 0, kind: input, shape index: {}]   ;;  %s397_s1 = inlined_call_operand.vmem [shape: bf16[32,128], index: 1, kind: input, shape index: {}]   ;;  %s398_s2 = inlined_call_operand.vmem [shape: f32[1,128], index: 2, kind: input, shape index: {}]   ;;  %s399_s3 = inlined_call_operand.vmem [shape: bf16[128,32], index: 3, kind: input, shape index: {}]   ;;  %s400_s4 = inlined_call_operand.vmem [shape: f32[1,32], index: 4, kind: input, shape index: {}]   ;;  %s401_s5 = inlined_call_operand.hbm [shape: f32[8,32], index: 5, kind: output, shape index: {}]  }
   0x1   :  { %v276_v0 = vld [vmem:[%s397_s1] sm:$0xff]   ;;  %245 = vmatprep.subr.bf16.mxu0 %v310_v1  ;;  %v277_v2 = vld [vmem:[%s397_s1 + $0x8] sm:$0xff]   ;;  %253 = vmatprep.subr.bf16.mxu1 %v310_v1  ;;  %v280_v7 = vld [vmem:[%s399_s3 + $0x10] sm:$0xff]  }
   0x2   :  { %246 = vmatpush3.bf16.msra.mxu0 %v276_v0  ;;  %249 = vmatprep.mubr.msk.bf16.mxu0 %vm311_vm0, %v310_v1  ;;  %v22_v3 = vld [vmem:[%s396_s0] sm:$0xff]  ;;  %v279_v6 = vld [vmem:[%s399_s3 + $0x8] sm:$0xff]  }
   0x3   :  { %247 = vmatprep.subr.bf16.mxu0 %v310_v1  ;;  %v278_v4 = vld [vmem:[%s399_s3] sm:$0xff]   ;;  %269 = vmatprep.mubr.msk.bf16.mxu1 %vm311_vm0, %v310_v1  ;;  %v23_v5 = vpack.c.bf16 %v22_v3, %v22_v3 }
   0x4   :  { %254 = vmatpush3.bf16.msra.mxu1 %v278_v4 }
   0x5   :  { %255 = vmatprep.subr.bf16.mxu1 %v310_v1 }
   0x6   :  { %248 = vmatpush3.bf16.msra.mxu0 %v277_v2 }
   0x8   :  { %256 = vmatpush3.bf16.msra.mxu1 %v279_v6 }
   0x9   :  { %250 = vmatmul.mubr.msk.bf16.vlgmr.msra.gmra.mrb[0].mxu0 %vm47_vm1, %v23_v5  ;;  %257 = vmatprep.subr.bf16.mxu1 %v310_v1 }
   0xa   :  { %10 = vsyncpa [#allocation3], 0  ;;  %v281_v8 = vld [vmem:[%s399_s3 + $0x18] sm:$0xff]   ;;  %v282_v9 = vld [vmem:[%s399_s3 + $0x20] sm:$0xff]   ;;  %s312_s17 = smov [#allocation2]  }
   0xb   :  { %v283_v10 = vld [vmem:[%s399_s3 + $0x28] sm:$0xff]   ;;  %v284_v11 = vld [vmem:[%s399_s3 + $0x30] sm:$0xff]   ;;  %v285_v12 = vld [vmem:[%s399_s3 + $0x38] sm:$0xff]   ;;  %s212_s3 = sshll.u32 %s312_s17, 4  ;;  %s213_s3 = int_to_ptr.vmem [resolvable:$true] %s212_s3 }
   0xc   :  { %258 = vmatpush3.bf16.msra.mxu1 %v280_v7  ;;  %v220_v13 = vld [vmem:[%s398_s2] ss:$0 sm:$0xff]  ;;  %s286_s2 = scalar_lea.vmem %s213_s3, 128  ;;  %p291_p1 = scmp.lt.s32.totalorder %s213_s3, %s213_s3 }
   0xd   :  { %259 = vmatprep.subr.bf16.mxu1 %v310_v1  ;;  %v224_v21 = vld [vmem:[%s400_s4] ss:$0 sm:$0xff]  ;;  %p287_p0 = scmp.ne.s32.totalorder %s213_s3, %s286_s2  ;;  %p292_p2 = scmp.lt.s32.totalorder %s286_s2, %s286_s2 }
   0xf   :  { %p293_p3 = por %p292_p2, %p291_p1 }
  0x10   :  { %260 = vmatpush3.bf16.msra.mxu1 %v281_v8 }
  0x11   :  { %261 = vmatprep.subr.bf16.mxu1 %v310_v1  ;;  %p294_p4 = pnand %p293_p3, %p287_p0 }
  0x14   :  { %262 = vmatpush3.bf16.msra.mxu1 %v282_v9 }
  0x15   :  { %263 = vmatprep.subr.bf16.mxu1 %v310_v1 }
  0x18   :  { %264 = vmatpush3.bf16.msra.mxu1 %v283_v10 }
  0x19   :  { %265 = vmatprep.subr.bf16.mxu1 %v310_v1 }
  0x1c   :  { %266 = vmatpush3.bf16.msra.mxu1 %v284_v11 }
  0x1d   :  { %267 = vmatprep.subr.bf16.mxu1 %v310_v1 }
  0x20   :  { %268 = vmatpush3.bf16.msra.mxu1 %v285_v12 }
  0xdc   :  { %v85_v14 = vpop.f32.mrb[0].mxu0 }
  0xdd   :  { %v86_v15 = vadd.f32 %v220_v13, %v85_v14  ;;  %v251_v16 = vpop.f32.mrb[1].mxu0 }
  0xde   :  { %v88_v17 = vpop.f32.mrb[2].mxu0 }
  0xdf   :  { %v91_v18 = vmax.f32 %v86_v15, 0.0  ;;  %v252_v19 = vpop.f32.mrb[3].mxu0 }
  0xe1   :  { %v92_v20 = vpack.c.bf16 %v91_v18, %v91_v18 }
  0xe3   :  { %270 = vmatmul.mubr.bf16.vlgmr.msra.gmra.mrb[0].mxu1 %v92_v20 }
 0x1b6   :  { %v198_v22 = vpop.f32.mrb[0].mxu1 }
 0x1b7   :  { %v199_v23 = vadd.f32 %v224_v21, %v198_v22  ;;  %v271_v24 = vpop.f32.mrb[1].mxu1 }
 0x1b8   :  { %v201_v25 = vpop.f32.mrb[2].mxu1 }
 0x1b9   :  { %v204_v26 = vmax.f32 %v199_v23, 0.0  ;;  %v272_v27 = vpop.f32.mrb[3].mxu1 }
 0x1bb   :  { %205 = vst.msk [vmem:[#allocation2] sm:$0xff] %vm47_vm1, %v204_v26 }
 0x1bc   :  { %297 = shalt.err (!%p294_p4)
}
 0x1bd   :  { %s298_s19 = scalar_lea.hbm %s401_s5, 128 }
 0x1be   :  { %p299_p5 = scmp.ne.s32.totalorder %s401_s5, %s298_s19  ;;  %p302_p6 = scmp.lt.u32.totalorder %s298_s19, %s401_s5 }
 0x1c0   :  { %p304_p7 = pnand %p302_p6, %p299_p5 }
 0x1c2   :  { %307 = shalt.err (!%p304_p7)
}
 0x1c3   :  { %215 = dma.vmem_to_hbm [thread:$0]  %s213_s3, 128, %s401_s5, [#allocation3]  }
 0x1c4   :  { %308 = dma.done.wait [#allocation3], 128  }
 0x1c5   :  { %309 = vsyncadd [#allocation3], 4294967168 }
 0x1c6   :  { %219 = vsyncpa [#allocation3], 1 }

</bundles_post_ra>
